<compile_context>
chip_gen: v5e
topology: v5e:2x2
jax: 0.10.0
libtpu: 0.0.40
codegen_flags: <defaults>
</compile_context>

<pallas_src>
import functools
import math

import numpy as np
import jax
import jax.numpy as jnp
from jax import lax
from jax.experimental import pallas as pl
from jax.experimental.pallas import tpu as pltpu


def _fft_loss_kernel(x_ref, y_ref, m_ref, cwsw_ref, csh_ref, out_ref, *,
                     nb, m_count, ragged):
    """One grid step: 2-D DFT (as MXU matmuls) of nb images of (x - y), masked
    complex magnitude, per-lane partial sums written to out_ref (1, 1, W)."""
    H = csh_ref.shape[1]
    W = cwsw_ref.shape[0]

    # Cast in-kernel; inputs arrive in their native dtype (no f32 HBM copies).
    d = x_ref[...].astype(jnp.float32) - y_ref[...].astype(jnp.float32)  # (nb,H,W)

    # Width-side DFT: one fat matmul against the fused [C_W | S_W] basis.
    #   T = D @ (C_W - i S_W)  ->  t[..., :W] = Tc,  t[..., W:] = Ts
    t = jnp.dot(d.reshape(nb * H, W), cwsw_ref[...],
                preferred_element_type=jnp.float32)                      # (nb*H, 2W)
    t3 = t.reshape(nb, H, 2 * W)

    # Height-side DFT: one batched matmul against the stacked [C_H ; S_H] basis
    # (equivalent to einsum('bgh,bhw->bgw')).  TODO(synk): very large H/W
    # (~1k+) would need spatial tiling of this stage to fit v7x's 64 MiB VMEM.
    csh_b = jnp.broadcast_to(csh_ref[...], (nb, 2 * H, H))
    u = lax.dot_general(csh_b, t3,
                        dimension_numbers=(((2,), (1,)), ((0,), (0,))),
                        preferred_element_type=jnp.float32)              # (nb,2H,2W)

    # F = (C_H - i S_H) D (C_W - i S_W) = (CC - SS) - i (CS + SC)
    yr = u[:, :H, :W] - u[:, H:, W:]          # real part
    yi = -(u[:, :H, W:] + u[:, H:, :W])       # imag part

    mk = m_ref[...].astype(jnp.float32)       # (nb,H,W) or shared (1,H,W)
    pr = yr * mk
    pi = yi * mk
    mag = jnp.sqrt(pr * pr + pi * pi)         # |(fft2(x) - fft2(y)) * mask|

    if ragged:
        # Last block reads past m_count (unspecified data); zero it exactly.
        bid = pl.program_id(0) * nb + lax.broadcasted_iota(jnp.int32, (nb, 1, 1), 0)
        mag = jnp.where(bid < m_count, mag, 0.0)

    s = jnp.sum(mag, axis=0)                              # (H, W)
    out_ref[0] = jnp.sum(s, axis=0, keepdims=True)        # (1, W) lane-dense row


@functools.lru_cache(maxsize=None)
def _dft_bases(H, W):
    """Forward (unnormalized) DFT bases, F = C - i*S, pre-fused for the kernel:
    csh = [C_H ; S_H] (2H, H) and cwsw = [C_W | S_W] (W, 2W).  Built once per
    (H, W) in numpy (int64 angle reduction -> no int32 overflow, no per-call
    transcendental recompute)."""
    def cs(n):
        k = np.arange(n, dtype=np.int64)
        ang = (2.0 * np.pi / n) * ((k[:, None] * k[None, :]) % n)
        return np.cos(ang).astype(np.float32), np.sin(ang).astype(np.float32)
    ch, sh = cs(H)
    cw, sw = cs(W)
    csh = np.concatenate([ch, sh], axis=0)      # (2H, H)
    cwsw = np.concatenate([cw, sw], axis=1)     # (W, 2W)
    return csh, cwsw


@jax.jit
def fft_loss(x, y, mask):
    """Pallas equivalent of fftLoss.forward: mean(|(fft2(x) - fft2(y)) * mask|)."""
    assert x.shape == y.shape and x.ndim >= 2
    *lead, H, W = x.shape
    m_count = math.prod(lead)
    total = m_count * H * W

    x3 = x.reshape(m_count, H, W)
    y3 = y.reshape(m_count, H, W)

    # |z * m| == |z| * |m|, so complex masks reduce exactly to their magnitude.
    mask = jnp.asarray(mask)
    if jnp.iscomplexobj(mask):
        mask = jnp.abs(mask)
    lead_m = mask.shape[:-2] if mask.ndim >= 2 else ()
    shared_mask = math.prod(lead_m) == 1
    if shared_mask:
        # Shared mask: keep it at (1, H, W) in HBM + grid-invariant BlockSpec
        # (no HBM broadcast materialization, ~1/3 less streamed DMA).
        m2 = mask if mask.ndim < 2 else mask.reshape(mask.shape[-2:])
        mk3 = jnp.broadcast_to(m2, (H, W)).reshape(1, H, W)
    else:
        mk3 = jnp.broadcast_to(mask, x.shape).reshape(m_count, H, W)

    csh, cwsw = _dft_bases(H, W)

    # ---- images per grid step (nb): budget the per-step VMEM working set ----
    try:
        vmem_cap = int(pltpu.get_tpu_info().vmem_capacity_bytes)
    except Exception:
        vmem_cap = 64 * 1024 * 1024            # conservative (v7x physical)
    xb, yb, mb = x.dtype.itemsize, y.dtype.itemsize, mk3.dtype.itemsize
    basis_bytes = 4 * (csh.size + cwsw.size)
    # double-buffered streamed inputs + f32 temporaries (d, t, u, yr/yi/mag...)
    # + the per-image broadcast copy of the height basis for the batched matmul
    per_img = 2 * H * W * (xb + yb) + 12 * H * W * 4 + 8 * H * H
    fixed = 2 * basis_bytes
    if shared_mask:
        fixed += 2 * H * W * mb
    else:
        per_img += 2 * H * W * mb
    budget = max(per_img + fixed, vmem_cap // 3)
    nb = max(1, (budget - fixed) // per_img)
    nb = min(nb, m_count)
    if m_count >= 2:
        # >= 2 grid steps so the "parallel" axis can feed both v7x TensorCores.
        nb = min(nb, -(-m_count // 2))
    nb = int(nb)
    g = -(-m_count // nb)
    ragged = (g * nb != m_count)               # masked in-kernel; no jnp.pad

    # Grid-invariant bases: single-buffer them when they are big enough to matter.
    if basis_bytes >= (1 << 20):
        def basis_spec(shape):
            return pl.BlockSpec(shape, lambda i: (0, 0), pipeline_mode=pl.Buffered(1))
    else:
        def basis_spec(shape):
            return pl.BlockSpec(shape, lambda i: (0, 0))

    if shared_mask:
        mask_spec = pl.BlockSpec((1, H, W), lambda i: (0, 0, 0))
    else:
        mask_spec = pl.BlockSpec((nb, H, W), lambda i: (i, 0, 0))

    kernel = functools.partial(_fft_loss_kernel, nb=nb, m_count=m_count,
                               ragged=ragged)

    partials = pl.pallas_call(
        kernel,
        out_shape=jax.ShapeDtypeStruct((g, 1, W), jnp.float32),
        grid_spec=pltpu.PrefetchScalarGridSpec(
            num_scalar_prefetch=0,
            grid=(g,),
            in_specs=[
                pl.BlockSpec((nb, H, W), lambda i: (i, 0, 0)),
                pl.BlockSpec((nb, H, W), lambda i: (i, 0, 0)),
                mask_spec,
                basis_spec((W, 2 * W)),
                basis_spec((2 * H, H)),
            ],
            out_specs=pl.BlockSpec((1, 1, W), lambda i: (i, 0, 0)),
        ),
        compiler_params=pltpu.CompilerParams(
            dimension_semantics=("parallel",),
            vmem_limit_bytes=int(vmem_cap * 3 // 4),
        ),
    )(x3, y3, mk3, jnp.asarray(cwsw), jnp.asarray(csh))

    return jnp.sum(partials) / jnp.float32(total)


def _fft_loss_ref(x, y, mask):
    """Pure-JAX reference mirroring the PyTorch forward."""
    diff = jnp.fft.fft2(x) - jnp.fft.fft2(y)
    return jnp.mean(jnp.abs(diff * mask))


if __name__ == "__main__":
    key = jax.random.PRNGKey(0)
    k1, k2, k3 = jax.random.split(key, 3)
    N, C, H, W = 2, 4, 16, 16
    x = jax.random.uniform(k1, (N, C, H, W), dtype=jnp.float32)
    y = jax.random.uniform(k2, (N, C, H, W), dtype=jnp.float32)
    mask = jax.random.uniform(k3, (N, C, H, W), dtype=jnp.float32)

    loss = fft_loss(x, y, mask)
    jax.block_until_ready(loss)

    ref = _fft_loss_ref(x, y, mask)
    assert jnp.allclose(loss, ref, rtol=1e-3, atol=1e-4), (loss, ref)

    print("KERNEL_OK")
</pallas_src>

<mosaic_0001>
module attributes {stable_mosaic.version = 11 : i64} {
  func.func @_fft_loss_kernel(%arg0: i32, %arg1: memref<4x16x16xf32, #tpu.memory_space<vmem>>, %arg2: memref<4x16x16xf32, #tpu.memory_space<vmem>>, %arg3: memref<4x16x16xf32, #tpu.memory_space<vmem>>, %arg4: memref<16x32xf32, #tpu.memory_space<vmem>>, %arg5: memref<32x16xf32, #tpu.memory_space<vmem>>, %arg6: memref<1x1x16xf32, #tpu.memory_space<vmem>>) attributes {dimension_semantics = [#tpu.dimension_semantics<parallel>], iteration_bounds = array<i64: 2>, scalar_prefetch = 0 : i64, scratch_operands = 0 : i64, tpu.core_type = #tpu.core_type<tc>, window_params = [{transform_indices = @transform_0, window_bounds = array<i64: 4, 16, 16>}, {transform_indices = @transform_1, window_bounds = array<i64: 4, 16, 16>}, {transform_indices = @transform_2, window_bounds = array<i64: 4, 16, 16>}, {pipeline_mode = #tpu.pipeline_mode<synchronous>, transform_indices = @transform_3, window_bounds = array<i64: 16, 32>}, {pipeline_mode = #tpu.pipeline_mode<synchronous>, transform_indices = @transform_4, window_bounds = array<i64: 32, 16>}, {transform_indices = @transform_5, window_bounds = array<i64: 1, 1, 16>}]} {
    %c0 = arith.constant 0 : index
    %c0_0 = arith.constant 0 : index
    %c0_1 = arith.constant 0 : index
    %0 = vector.load %arg1[%c0, %c0_0, %c0_1] : memref<4x16x16xf32, #tpu.memory_space<vmem>>, vector<4x16x16xf32>
    %c0_2 = arith.constant 0 : index
    %c0_3 = arith.constant 0 : index
    %c0_4 = arith.constant 0 : index
    %1 = vector.load %arg2[%c0_2, %c0_3, %c0_4] : memref<4x16x16xf32, #tpu.memory_space<vmem>>, vector<4x16x16xf32>
    %2 = arith.subf %0, %1 : vector<4x16x16xf32>
    %3 = vector.shape_cast %2 : vector<4x16x16xf32> to vector<64x16xf32>
    %c0_5 = arith.constant 0 : index
    %c0_6 = arith.constant 0 : index
    %4 = vector.load %arg4[%c0_5, %c0_6] : memref<16x32xf32, #tpu.memory_space<vmem>>, vector<16x32xf32>
    %cst = arith.constant dense<0.000000e+00> : vector<64x32xf32>
    %5 = tpu.matmul %3, %4, %cst {dimension_numbers = #tpu.dot_dimension_numbers<[1], [0], [0], [1], [0, 0, 1, 1], [], []>} : vector<64x16xf32>, vector<16x32xf32>, vector<64x32xf32> -> vector<64x32xf32>
    %6 = vector.shape_cast %5 : vector<64x32xf32> to vector<4x16x32xf32>
    %c0_7 = arith.constant 0 : index
    %c0_8 = arith.constant 0 : index
    %7 = vector.load %arg5[%c0_7, %c0_8] : memref<32x16xf32, #tpu.memory_space<vmem>>, vector<32x16xf32>
    %8 = vector.shape_cast %7 : vector<32x16xf32> to vector<1x32x16xf32>
    %9 = vector.broadcast %8 : vector<1x32x16xf32> to vector<4x32x16xf32>
    %cst_9 = arith.constant dense<0.000000e+00> : vector<4x32x32xf32>
    %10 = tpu.matmul %9, %6, %cst_9 {dimension_numbers = #tpu.dot_dimension_numbers<[2], [1], [1], [2], [0, 0, 0, 1, 1, 2], [0], [0]>} : vector<4x32x16xf32>, vector<4x16x32xf32>, vector<4x32x32xf32> -> vector<4x32x32xf32>
    %11 = vector.extract_strided_slice %10 {offsets = [0, 0, 0], sizes = [4, 16, 16], strides = [1, 1, 1]} : vector<4x32x32xf32> to vector<4x16x16xf32>
    %12 = vector.extract_strided_slice %10 {offsets = [0, 16, 16], sizes = [4, 16, 16], strides = [1, 1, 1]} : vector<4x32x32xf32> to vector<4x16x16xf32>
    %13 = arith.subf %11, %12 : vector<4x16x16xf32>
    %14 = vector.extract_strided_slice %10 {offsets = [0, 0, 16], sizes = [4, 16, 16], strides = [1, 1, 1]} : vector<4x32x32xf32> to vector<4x16x16xf32>
    %15 = vector.extract_strided_slice %10 {offsets = [0, 16, 0], sizes = [4, 16, 16], strides = [1, 1, 1]} : vector<4x32x32xf32> to vector<4x16x16xf32>
    %16 = arith.addf %14, %15 : vector<4x16x16xf32>
    %cst_10 = arith.constant 0.000000e+00 : f32
    %17 = vector.broadcast %cst_10 : f32 to vector<4x16x16xf32>
    %18 = arith.subf %17, %16 : vector<4x16x16xf32>
    %c0_11 = arith.constant 0 : index
    %c0_12 = arith.constant 0 : index
    %c0_13 = arith.constant 0 : index
    %19 = vector.load %arg3[%c0_11, %c0_12, %c0_13] : memref<4x16x16xf32, #tpu.memory_space<vmem>>, vector<4x16x16xf32>
    %20 = arith.mulf %13, %19 : vector<4x16x16xf32>
    %21 = arith.mulf %18, %19 : vector<4x16x16xf32>
    %22 = arith.mulf %20, %20 : vector<4x16x16xf32>
    %23 = arith.mulf %21, %21 : vector<4x16x16xf32>
    %24 = arith.addf %22, %23 : vector<4x16x16xf32>
    %25 = math.sqrt %24 : vector<4x16x16xf32>
    %cst_14 = arith.constant dense<0.000000e+00> : vector<16x16xf32>
    %26 = vector.multi_reduction <add>, %25, %cst_14 [0] : vector<4x16x16xf32> to vector<16x16xf32>
    %cst_15 = arith.constant dense<0.000000e+00> : vector<16xf32>
    %27 = vector.multi_reduction <add>, %26, %cst_15 [0] : vector<16x16xf32> to vector<16xf32>
    %28 = vector.shape_cast %27 : vector<16xf32> to vector<1x16xf32>
    %c0_16 = arith.constant 0 : index
    %c0_17 = arith.constant 0 : index
    %c0_18 = arith.constant 0 : index
    %29 = vector.load %arg6[%c0_16, %c0_17, %c0_18] : memref<1x1x16xf32, #tpu.memory_space<vmem>>, vector<1x1x16xf32>
    %30 = vector.shape_cast %29 : vector<1x1x16xf32> to vector<1x16xf32>
    %31 = vector.shape_cast %28 : vector<1x16xf32> to vector<1x1x16xf32>
    tpu.vector_store %arg6[%c0_16, %c0_17, %c0_18], %31 {strides = array<i32>} : memref<1x1x16xf32, #tpu.memory_space<vmem>>, vector<1x1x16xf32>,
    return
  }
  func.func @transform_0(%arg0: i32) -> (i32, i32, i32) {
    %c0_i32 = arith.constant 0 : i32
    %c0_i32_0 = arith.constant 0 : i32
    %c0_i32_1 = arith.constant 0 : i32
    return %arg0, %c0_i32, %c0_i32_0 : i32, i32, i32
  }
  func.func @transform_1(%arg0: i32) -> (i32, i32, i32) {
    %c0_i32 = arith.constant 0 : i32
    %c0_i32_0 = arith.constant 0 : i32
    %c0_i32_1 = arith.constant 0 : i32
    return %arg0, %c0_i32, %c0_i32_0 : i32, i32, i32
  }
  func.func @transform_2(%arg0: i32) -> (i32, i32, i32) {
    %c0_i32 = arith.constant 0 : i32
    %c0_i32_0 = arith.constant 0 : i32
    %c0_i32_1 = arith.constant 0 : i32
    return %arg0, %c0_i32, %c0_i32_0 : i32, i32, i32
  }
  func.func @transform_3(%arg0: i32) -> (i32, i32) {
    %c0_i32 = arith.constant 0 : i32
    %c0_i32_0 = arith.constant 0 : i32
    %c0_i32_1 = arith.constant 0 : i32
    return %c0_i32, %c0_i32_0 : i32, i32
  }
  func.func @transform_4(%arg0: i32) -> (i32, i32) {
    %c0_i32 = arith.constant 0 : i32
    %c0_i32_0 = arith.constant 0 : i32
    %c0_i32_1 = arith.constant 0 : i32
    return %c0_i32, %c0_i32_0 : i32, i32
  }
  func.func @transform_5(%arg0: i32) -> (i32, i32, i32) {
    %c0_i32 = arith.constant 0 : i32
    %c0_i32_0 = arith.constant 0 : i32
    %c0_i32_1 = arith.constant 0 : i32
    return %arg0, %c0_i32, %c0_i32_0 : i32, i32, i32
  }
}

</mosaic_0001>

<bundles_post_ra>
// kernel: fft_loss.1
= control target key start
LH: loop header
LB: loop body
LE: loop exit
PB: predicated region body
PF: predicated region fallthrough
CT: control target
= control target key end

     0   :  { %s1831_s0 = inlined_call_operand.hbm [shape: f32[8,16,16], index: 0, kind: input, shape index: {}]   ;;  %s1832_s1 = inlined_call_operand.hbm [shape: f32[8,16,16], index: 1, kind: input, shape index: {}]   ;;  %s1833_s2 = inlined_call_operand.hbm [shape: f32[8,16,16], index: 2, kind: input, shape index: {}]   ;;  %s1834_s3 = inlined_call_operand.hbm [shape: f32[16,32], index: 3, kind: input, shape index: {}]   ;;  %s1835_s4 = inlined_call_operand.hbm [shape: f32[32,16], index: 4, kind: input, shape index: {}]   ;;  %s1836_s5 = inlined_call_operand.vmem [shape: f32[2,1,16], index: 5, kind: output, shape index: {}]  }
   0x1   :  { %1838 = sst [smem:[#allocation13_spill]] %s1832_s1 }
   0x2   :  { %10 = vsyncpa [#allocation3], 0 }
   0x3   :  { %12 = vsyncpa [#allocation3 + $0x1], 0 }
   0x4   :  { %13 = vsyncpa [#allocation5], 0 }
   0x5   :  { %15 = vsyncpa [#allocation5 + $0x1], 0 }
   0x6   :  { %16 = vsyncpa [#allocation8], 0  ;;  %s1400_s18 = smov 0   ;;  %s1402_s19 = smov 0  }
   0x7   :  { %s1404_s20 = smov 0   ;;  %s1406_s21 = smov 0  }
   0x8 LB: > { %s1419_s22 = sadd.s32 4294967295, %s1362_s21   ;;  %p42_p0 = scmp.ne.s32.totalorder %s1354_s19, %s1350_s18  ;;  %s1362_s21 = sphi %s1406_s21, %s1848_s21   ;;  %s1358_s20 = sphi %s1404_s20, %s1847_s20   ;;  %s1354_s19 = sphi %s1402_s19, %s1846_s19   ;;  %s1350_s18 = sphi %s1400_s18, %s1845_s18  }
   0x9   : > { %p43_p1 = scmp.eq.s32.totalorder %s1419_s22, 0  ;;  %p1022_p2 = scmp.ge.s32.totalorder %s1362_s21, 1 }
   0xa   : > { %p173_p3 = scmp.lt.s32.totalorder %s1362_s21, 3  ;;  %s184_s26 = sshll.u32 %s1834_s3, 4  ;;  %s185_s26 = int_to_ptr.hbm [resolvable:$true] %s184_s26 }
   0xb   : > { %p1427_p4 = por %p43_p1, %p42_p0  ;;  %s1364_s28 = smov [#allocation7]  }
   0xc   : > { %p1434_p5 = pnand %p1022_p2, %p173_p3  ;;  %s186_s29 = sshll.u32 %s1364_s28, 4  ;;  %s187_s29 = int_to_ptr.vmem [resolvable:$true] %s186_s29 }
   0xd   : > { %s1447_s6 = sadd.s32 1, %s1362_s21   ;;  %s1365_s7 = smov 128  }
   0xe   : > { %p1094_p6 = pneg %p1434_p5  ;;  %s1366_s8 = smov 8  }
   0xf   : > { %s26_s9 = ssub.s32 %s1362_s21, %s1447_s6  ;;  %s29_s10 = sadd.s32 1, %s1358_s20 }
  0x10   : > { %p1442_p7 = pnand %p1094_p6, %p43_p1  ;;  %p27_p8 = scmp.eq.s32.totalorder %s26_s9, 0 }
  0x11   : > { %p36_p9 = scmp.ne.s32.totalorder %s1358_s20, %s1354_s19  ;;  %p37_p10 = scmp.eq.s32.totalorder %s1362_s21, 0 }
  0x12   : > { %1097 = dma.hbm_to_vmem [thread:$0]  (!%p1442_p7), %s185_s26, 256, %s187_s29, [#allocation8], %s1365_s7, %s1365_s7, %s1366_s8  }
  0x13   : > { %p1113_p11 = scmp.lt.s32.totalorder %s1362_s21, 2  ;;  %p38_p12 = por %p37_p10, %p36_p9 }
  0x14   : > { %s1462_s11 = scalar_select %p27_p8, %s1358_s20, %s29_s10  }
  0x15   : > { %s1837_s12 = sand.u32 1, %s1358_s20   ;;  %s1470_s14 = sshll.u32 %s1362_s21, 6 }
  0x16   : > { %s1467_s13 = sshll.u32 %s1837_s12, 6  ;;  %p1472_p13 = pnand %p1113_p11, %p38_p12 }
  0x17   : > { %s237_s16 = sand.u32 1, %s1362_s21   ;;  %s1843_s1 = sld [smem:[#allocation13_spill]] }
  0x18   : > { %s241_s26 = scalar_lea.vmem [#allocation4], %s1467_s13  ;;  %s1482_s29 = scalar_lea.sflag [#allocation5], %s237_s16 }
  0x19   : > { %s250_s28 = sshll.u32 %s241_s26, 4  ;;  %p1204_p2 = pneg %p1472_p13  ;;  %s251_s28 = int_to_ptr.vmem [resolvable:$true] %s250_s28 }
  0x1d   : > { %s247_s24 = scalar_lea.hbm %s1843_s1, %s1470_s14  ;;  %s1207_s18 = scalar_lea.hbm %s1843_s1, 128 }
  0x1e   : > { %s248_s25 = sshll.u32 %s247_s24, 4  ;;  %s249_s25 = int_to_ptr.hbm [resolvable:$true] %s248_s25 }
  0x1f   : > { %s1200_s9 = sshra.s32 %s249_s25, 4  ;;  %s1201_s9 = int_to_ptr.hbm [resolvable:$true] %s1200_s9 }
  0x20   : > { %s1202_s10 = scalar_lea.hbm %s1201_s9, 64  ;;  %p1208_p8 = scmp.lt.s32.totalorder %s1201_s9, %s1843_s1 }
  0x21   : > { %p1203_p0 = scmp.ne.s32.totalorder %s1201_s9, %s1202_s10  ;;  %p1209_p9 = scmp.lt.s32.totalorder %s1207_s18, %s1202_s10 }
  0x23   : > { %p1205_p3 = pnand %p1204_p2, %p1203_p0  ;;  %p1210_p10 = por %p1209_p9, %p1208_p8 }
  0x25   : > { %p1206_p6 = pneg %p1205_p3 }
  0x27   : > { %p1211_p11 = pnand %p1210_p10, %p1206_p6 }
  0x29   : > { %1214 = shalt.err (!%p1211_p11)
}
  0x2a   : > { %1107 = dma.hbm_to_vmem [thread:$0]  (!%p1472_p13), %s249_s25, 1024, %s251_s28, %s1482_s29, %s1365_s7, %s1365_s7, %s1366_s8  }
  0x2b   : > { %s198_s17 = sshll.u32 %s1835_s4, 4  ;;  %s1367_s9 = smov [#allocation9]   ;;  %s199_s17 = int_to_ptr.hbm [resolvable:$true] %s198_s17 }
  0x2c   : > { %s200_s10 = sshll.u32 %s1367_s9, 4  ;;  %s224_s26 = scalar_lea.hbm %s1831_s0, %s1470_s14  ;;  %s201_s10 = int_to_ptr.vmem [resolvable:$true] %s200_s10 }
  0x2d   : > { %1100 = dma.hbm_to_vmem [thread:$0]  (!%p1442_p7), %s199_s17, 512, %s201_s10, [#allocation8], %s1365_s7, %s1365_s7, %s1366_s8  }
  0x2e   : > { %s225_s12 = sshll.u32 %s224_s26, 4  ;;  %s218_s25 = scalar_lea.vmem [#allocation2], %s1467_s13  ;;  %s226_s12 = int_to_ptr.hbm [resolvable:$true] %s225_s12 }
  0x2f   : > { %s227_s28 = sshll.u32 %s218_s25, 4  ;;  %s1844_s16 = sand.u32 1, %s1358_s20   ;;  %s228_s28 = int_to_ptr.vmem [resolvable:$true] %s227_s28 }
  0x30   : > { %s215_s21 = scalar_lea.sflag [#allocation3], %s1844_s16  ;;  %s1260_s1 = sshra.s32 %s226_s12, 4  ;;  %s1261_s1 = int_to_ptr.hbm [resolvable:$true] %s1260_s1 }
  0x31   : > { %s1262_s9 = scalar_lea.hbm %s1261_s1, 64  ;;  %s1267_s10 = scalar_lea.hbm %s1831_s0, 128 }
  0x32   : > { %p1263_p12 = scmp.ne.s32.totalorder %s1261_s1, %s1262_s9  ;;  %p1268_p7 = scmp.lt.s32.totalorder %s1261_s1, %s1831_s0 }
  0x33   : > { %p1269_p6 = scmp.lt.s32.totalorder %s1267_s10, %s1262_s9 }
  0x34   : > { %p1265_p0 = pnand %p1263_p12, %p1204_p2 }
  0x35   : > { %p1270_p8 = por %p1269_p6, %p1268_p7 }
  0x36   : > { %p1266_p3 = pneg %p1265_p0 }
  0x38   : > { %p1271_p9 = pnand %p1270_p8, %p1266_p3 }
  0x3a   : > { %1274 = shalt.err (!%p1271_p9)
}
  0x3b   : > { %1104 = dma.hbm_to_vmem [thread:$0]  (!%p1472_p13), %s226_s12, 1024, %s228_s28, %s215_s21, %s1365_s7, %s1365_s7, %s1366_s8  }
  0x3c   : > { %s270_s16 = scalar_lea.hbm %s1833_s2, %s1470_s14  ;;  %s264_s17 = scalar_lea.vmem [#allocation6], %s1467_s13 }
  0x3d   : > { %s271_s30 = sshll.u32 %s270_s16, 4  ;;  %s273_s1 = sshll.u32 %s264_s17, 4  ;;  %s272_s30 = int_to_ptr.hbm [resolvable:$true] %s271_s30  ;;  %s274_s1 = int_to_ptr.vmem [resolvable:$true] %s273_s1 }
  0x3e   : > { %s1290_s9 = sshra.s32 %s272_s30, 4  ;;  %s1297_s12 = scalar_lea.hbm %s1833_s2, 128  ;;  %s1291_s9 = int_to_ptr.hbm [resolvable:$true] %s1290_s9 }
  0x3f   : > { %s1292_s10 = scalar_lea.hbm %s1291_s9, 64  ;;  %p1298_p0 = scmp.lt.s32.totalorder %s1291_s9, %s1833_s2 }
  0x40   : > { %p1293_p10 = scmp.ne.s32.totalorder %s1291_s9, %s1292_s10  ;;  %p1299_p3 = scmp.lt.s32.totalorder %s1297_s12, %s1292_s10 }
  0x42   : > { %p1295_p11 = pnand %p1293_p10, %p1204_p2  ;;  %p1300_p7 = por %p1299_p3, %p1298_p0 }
  0x44   : > { %p1296_p12 = pneg %p1295_p11 }
  0x46   : > { %p1301_p6 = pnand %p1300_p7, %p1296_p12 }
  0x48   : > { %1304 = shalt.err (!%p1301_p6)
}
  0x49   : > { %1110 = dma.hbm_to_vmem [thread:$0]  (!%p1472_p13), %s272_s30, 1024, %s274_s1, %s1482_s29, %s1365_s7, %s1365_s7, %s1366_s8  }
  0x4a   : > { %285 = sbr.rel (%p1434_p5) target bundleno = 695 (0x2b7), region = 40  ;;  %s287_s13 = sand.u32 (!%p1434_p5), 1, %s1354_s19  }
  0x4b   : > { %s1039_s14 = sshll.u32 (!%p1434_p5), %s287_s13, 6  ;;  %s288_s26 = scalar_lea.sflag (!%p1434_p5), [#allocation3], %s287_s13 }
  0x4c   : > { %s1553_s25 = scalar_lea.vmem (!%p1434_p5), [#allocation2], %s1039_s14 }
  0x4f   : > { %1337 = dma.done.wait (%p1427_p4), %s288_s26, 1024  }
  0x50   : > { %1339 = vsyncadd (%p1427_p4), %s288_s26, 4294966272  ;;  %s297_s15 = sand.u32 1, %s1419_s22   ;;  %s1560_s7 = scalar_lea.vmem [#allocation4], %s1039_s14 }
  0x51   : > { %s298_s16 = scalar_lea.sflag [#allocation5], %s297_s15 }
  0x52   : > { %1341 = dma.done.wait (%p1427_p4), %s298_s16, 2048  }
  0x53   : > { %1343 = vsyncadd (%p1427_p4), %s298_s16, 4294965248  ;;  %s1566_s27 = scalar_lea.vmem [#allocation6], %s1039_s14 }
  0x54   : > { %1345 = dma.done.wait (%p43_p1), [#allocation8], 768  }
  0x55   : > { %1347 = vsyncadd (%p43_p1), [#allocation8], 4294966528  ;;  %v388_v0 = vld [vmem:[#allocation7 + $0x8] sm:$0xff]  ;;  %v387_v1 = vld [vmem:[#allocation7] sm:$0xff]  ;;  %vm389_vm0 = vcmask 130048   ;;  %s1368_s23 = smov 16  }
  0x56   : > { %v363_v2 = vld [vmem:[%s1553_s25] sm:$0xff]  ;;  %428 = vmatpush.msra.mxu0 %v388_v0  ;;  %1076 = vmatpush.msra.mxu2 %v388_v0  ;;  %v369_v4 = vld [vmem:[%s1553_s25 + $0x30] sm:$0xff]  ;;  %v364_v8 = vld [vmem:[%s1553_s25 + $0x8] sm:$0xff]  ;;  %s1369_s8 = smov 112   ;;  %p360_p1 = scmp.lt.s32.totalorder %s1419_s22, 1 }
  0x57   : > { %v371_v3 = vld [vmem:[%s1560_s7] sm:$0xff]  ;;  %v377_v5 = vld [vmem:[%s1560_s7 + $0x30] sm:$0xff]  ;;  %v372_v9 = vld [vmem:[%s1560_s7 + $0x8] sm:$0xff] }
  0x58   : > { %v379_v6 = vsub.f32 %v363_v2, %v371_v3  ;;  %v385_v7 = vsub.f32 %v369_v4, %v377_v5  ;;  %429 = vmatpush.msra.mxu0 %v387_v1  ;;  %1077 = vmatpush.msra.mxu2 %v387_v1  ;;  %v370_v10 = vld [vmem:[%s1553_s25 + $0x38] sm:$0xff]  ;;  %v380_v12 = vsub.f32 %v364_v8, %v372_v9  ;;  %v365_v14 = vld [vmem:[%s1553_s25 + $0x10] sm:$0xff]  ;;  %v367_v20 = vld [vmem:[%s1553_s25 + $0x20] sm:$0xff]  ;;  %s1850_s22 = smov (!%p360_p1, %s1419_s22), 1 }
  0x59   : > { %v378_v11 = vld [vmem:[%s1560_s7 + $0x38] sm:$0xff]  ;;  %v373_v15 = vld [vmem:[%s1560_s7 + $0x10] sm:$0xff]  ;;  %v375_v21 = vld [vmem:[%s1560_s7 + $0x20] sm:$0xff]  ;;  %s362_s17 = scalar_lea.vmem %s1836_s5, %s1850_s22 }
  0x5a   : > { %1044 = vmatmul.msk.f32.vlgmr.msra.gmra.mxu0 %vm389_vm0, %v379_v6  ;;  %1050 = vmatmul.msk.f32.vlgmr.msra.gmra.mxu2 %vm389_vm0, %v385_v7  ;;  %v386_v13 = vsub.f32 %v370_v10, %v378_v11  ;;  %v381_v16 = vsub.f32 %v365_v14, %v373_v15  ;;  %v366_v17 = vld [vmem:[%s1553_s25 + $0x18] sm:$0xff]  ;;  %v383_v22 = vsub.f32 %v367_v20, %v375_v21  ;;  %v368_v23 = vld [vmem:[%s1553_s25 + $0x28] sm:$0xff]  ;;  %v455_v29 = vld [vmem:[#allocation9] sm:$0xff] }
  0x5b   : > { %v374_v18 = vld [vmem:[%s1560_s7 + $0x18] sm:$0xff]  ;;  %v376_v24 = vld [vmem:[%s1560_s7 + $0x28] sm:$0xff]  ;;  %v457_v30 = vld [vmem:[#allocation9 + $0x10] sm:$0xff] }
  0x5c   : > { %v382_v19 = vsub.f32 %v366_v17, %v374_v18  ;;  %v384_v25 = vsub.f32 %v368_v23, %v376_v24  ;;  %v456_v33 = vld [vmem:[#allocation9 + $0x8] sm:$0xff]  ;;  %v458_v34 = vld [vmem:[#allocation9 + $0x18] sm:$0xff]  ;;  %v1610_v39 = vld [vmem:[%s1566_s27 + $0x20] sm:$0xff] }
  0x5d   : > { %v1605_v37 = vld [vmem:[%s1566_s27 + $0x8] sm:$0xff]  ;;  %v1623_v40 = vld [vmem:[%s1566_s27 + $0x10] sm:$0xff]  ;;  %v1630_v42 = vld [vmem:[%s1566_s27] sm:$0xff] }
  0x5e   : > { %693 = vrot.lane.b32.xlu0 %v1605_v37, %s1368_s23  ;;  %695 = vrot.lane.b32.xlu1 %v1623_v40, %s1368_s23  ;;  %v1638_v46 = vld [vmem:[%s1566_s27 + $0x18] sm:$0xff]  ;;  %v1667_v59 = vld [vmem:[%s1566_s27 + $0x28] sm:$0xff] }
  0x5f   : > { %691 = vrot.lane.b32.xlu2 %v1630_v42, %s1368_s23  ;;  %v1656_v54 = vld [vmem:[%s1566_s27 + $0x38] sm:$0xff]  ;;  %v1674_v61 = vld [vmem:[%s1566_s27 + $0x30] sm:$0xff] }
  0x62   : > { %1045 = vmatmul.msk.f32.gmra.mxu0 %vm389_vm0, %v380_v12  ;;  %1051 = vmatmul.msk.f32.gmra.mxu2 %vm389_vm0, %v386_v13 }
  0x66   : > { %699 = vrot.lane.b32.xlu0 %v1610_v39, %s1368_s23 }
  0x67   : > { %697 = vrot.lane.b32.xlu2 %v1638_v46, %s1368_s23 }
  0x6a   : > { %1046 = vmatmul.msk.f32.gmra.mxu0 %vm389_vm0, %v381_v16 }
  0x72   : > { %1047 = vmatmul.msk.f32.gmra.mxu0 %vm389_vm0, %v382_v19 }
  0x7a   : > { %1048 = vmatmul.msk.f32.gmra.mxu0 %vm389_vm0, %v383_v22 }
  0x82   : > { %1049 = vmatmul.msk.f32.gmra.mxu0 %vm389_vm0, %v384_v25 }
  0xb9   : > { %v692_v2 = vpop.permute.xlu2 %691 }
  0xc1   : > { %v698_v10 = vpop.permute.xlu2 %697 }
  0xd0   : > { %v694_v62 = vpop.permute.xlu0 %693  ;;  %v696_v12 = vpop.permute.xlu1 %695 }
  0xd7   : > { %v431_v26 = vpop.f32.mrf.mxu0 }
  0xd8   : > { %v700_v63 = vpop.permute.xlu0 %699 }
  0xdd   : > { %v449_v27 = vpop.f32.mrf.mxu2 }
  0xdf   : > { %v434_v28 = vpop.f32.mrf.mxu0 }
  0xe0   : > { %485 = vmatpush.msra.mxu1 %v434_v28  ;;  %1078 = vmatpush.msra.mxu3 %v434_v28 }
  0xe2   : > { %486 = vmatpush.msra.mxu1 %v431_v26  ;;  %1079 = vmatpush.msra.mxu3 %v431_v26 }
  0xe3   : > { %1052 = vmatmul.msk.f32.vlgmr.msra.gmra.mxu1 %vm389_vm0, %v455_v29  ;;  %1054 = vmatmul.msk.f32.vlgmr.msra.gmra.mxu3 %vm389_vm0, %v457_v30 }
  0xe5   : > { %v452_v31 = vpop.f32.mrf.mxu2 }
  0xe6   : > { %572 = vmatpush.msrb.mxu1 %v452_v31 }
  0xe7   : > { %v437_v32 = vpop.f32.mrf.mxu0 }
  0xe8   : > { %573 = vmatpush.msrb.mxu1 %v449_v27 }
  0xeb   : > { %1053 = vmatmul.msk.f32.gmra.mxu1 %vm389_vm0, %v456_v33  ;;  %1055 = vmatmul.msk.f32.gmra.mxu3 %vm389_vm0, %v458_v34 }
  0xef   : > { %v440_v35 = vpop.f32.mrf.mxu0 }
  0xf0   : > { %514 = vmatpush.msrb.mxu2 %v440_v35 }
  0xf2   : > { %515 = vmatpush.msrb.mxu2 %v437_v32 }
  0xf3   : > { %1056 = vmatmul.msk.f32.vlgmr.msrb.gmra.mxu2 %vm389_vm0, %v455_v29  ;;  %1064 = vmatmul.msk.f32.vlgmr.msrb.gmra.mxu1 %vm389_vm0, %v455_v29 }
  0xf7   : > { %v443_v36 = vpop.f32.mrf.mxu0 }
  0xfb   : > { %1057 = vmatmul.msk.f32.gmra.mxu2 %vm389_vm0, %v456_v33  ;;  %1065 = vmatmul.msk.f32.gmra.mxu1 %vm389_vm0, %v456_v33 }
  0xff   : > { %v446_v38 = vpop.f32.mrf.mxu0 }
 0x100   : > { %543 = vmatpush.msrb.mxu3 %v446_v38 }
 0x102   : > { %544 = vmatpush.msrb.mxu3 %v443_v36 }
 0x103   : > { %1058 = vmatmul.msk.f32.gmra.mxu2 %vm389_vm0, %v457_v30  ;;  %1060 = vmatmul.msk.f32.vlgmr.msrb.gmra.mxu3 %vm389_vm0, %v455_v29 }
 0x104   : > { %1066 = vmatmul.msk.f32.gmra.mxu1 %vm389_vm0, %v457_v30 }
 0x10b   : > { %1061 = vmatmul.msk.f32.gmra.mxu3 %vm389_vm0, %v456_v33  ;;  %1059 = vmatmul.msk.f32.gmra.mxu2 %vm389_vm0, %v458_v34 }
 0x10c   : > { %1067 = vmatmul.msk.f32.gmra.mxu1 %vm389_vm0, %v458_v34 }
 0x113   : > { %1062 = vmatmul.msk.f32.gmra.mxu3 %vm389_vm0, %v457_v30 }
 0x11b   : > { %1063 = vmatmul.msk.f32.gmra.mxu3 %vm389_vm0, %v458_v34 }
 0x160   : > { %v1627_v41 = vpop.f32.mrf.mxu1 }
 0x166   : > { %v494_v43 = vpop.f32.mrf.mxu3 }
 0x167   : > { %627 = vrot.lane.b32.xlu0 %v494_v43, %s1368_s23 }
 0x168   : > { %v1635_v44 = vpop.f32.mrf.mxu1 }
 0x16e   : > { %v497_v45 = vpop.f32.mrf.mxu3 }
 0x16f   : > { %629 = vrot.lane.b32.xlu0 %v497_v45, %s1368_s23 }
 0x170   : > { %v1643_v47 = vpop.f32.mrf.mxu1 }
 0x176   : > { %v1645_v48 = vpop.f32.mrf.mxu2 }
 0x178   : > { %v1647_v49 = vpop.f32.mrf.mxu1 }
 0x17e   : > { %v1649_v50 = vpop.f32.mrf.mxu2 }
 0x181   : > { %v581_v51 = vpop.f32.mrf.mxu1 }
 0x182   : > { %639 = vrot.lane.b32.xlu0 %v581_v51, %s1368_s23 }
 0x186   : > { %v523_v52 = vpop.f32.mrf.mxu2  ;;  %v1652_v53 = vpop.f32.mrf.mxu3 }
 0x187   : > { %631 = vrot.lane.b32.xlu1 %v523_v52, %s1368_s23 }
 0x189   : > { %v584_v55 = vpop.f32.mrf.mxu1 }
 0x18a   : > { %705 = vrot.lane.b32.xlu0 %v1656_v54, %s1368_s23 }
 0x18e   : > { %v1660_v56 = vpop.f32.mrf.mxu3  ;;  %v526_v57 = vpop.f32.mrf.mxu2 }
 0x18f   : > { %641 = vrot.lane.b32.xlu1 %v584_v55, %s1368_s23 }
 0x192   : > { %599 = vrot.lane.b32.xlu0 %v523_v52, %s1369_s8 }
 0x196   : > { %v552_v58 = vpop.f32.mrf.mxu3 }
 0x197   : > { %633 = vrot.lane.b32.xlu1 %v526_v57, %s1368_s23  ;;  %635 = vrot.lane.b32.xlu2 %v552_v58, %s1368_s23 }
 0x19e   : > { %v555_v60 = vpop.f32.mrf.mxu3 }
 0x19f   : > { %701 = vrot.lane.b32.xlu1 %v1667_v59, %s1368_s23  ;;  %605 = vrot.lane.b32.xlu0 %v555_v60, %s1369_s8 }
 0x1a0   : > { %637 = vrot.lane.b32.xlu2 %v555_v60, %s1368_s23 }
 0x1a7   : > { %595 = vrot.lane.b32.xlu1 %v494_v43, %s1369_s8 }
 0x1a8   : > { %703 = vrot.lane.b32.xlu2 %v1674_v61, %s1368_s23 }
 0x1af   : > { %601 = vrot.lane.b32.xlu1 %v526_v57, %s1369_s8 }
 0x1b0   : > { %597 = vrot.lane.b32.xlu2 %v497_v45, %s1369_s8 }
 0x1b7   : > { %607 = vrot.lane.b32.xlu1 %v581_v51, %s1369_s8 }
 0x1b8   : > { %603 = vrot.lane.b32.xlu2 %v552_v58, %s1369_s8 }
 0x1c0   : > { %609 = vrot.lane.b32.xlu2 %v584_v55, %s1369_s8 }
 0x1d9   : > { %v628_v0 = vpop.permute.xlu0 %627 }
 0x1da   : > { %v651_v1 = vadd.f32 %v628_v0, %v1627_v41 }
 0x1dc   : > { %v659_v3 = vsub.f32 0.0, %v651_v1 }
 0x1de   : > { %v715_v4 = vmul.f32 %v692_v2, %v659_v3 }
 0x1e0   : > { %v731_v5 = vmul.f32 %v715_v4, %v715_v4 }
 0x1e1   : > { %v630_v6 = vpop.permute.xlu0 %629 }
 0x1e2   : > { %v652_v7 = vadd.f32 %v630_v6, %v1635_v44  ;;  %747 = vrot.lane.b32.xlu0 %v731_v5, %s1369_s8 }
 0x1e4   : > { %v660_v8 = vsub.f32 0.0, %v652_v7 }
 0x1e6   : > { %v716_v9 = vmul.f32 %v694_v62, %v660_v8 }
 0x1e8   : > { %v732_v11 = vmul.f32 %v716_v9, %v716_v9 }
 0x1ea   : > { %749 = vrot.lane.b32.xlu1 %v732_v11, %s1369_s8 }
 0x1f1   : > { %v636_v13 = vpop.permute.xlu2 %635 }
 0x1f2   : > { %v655_v14 = vadd.f32 %v636_v13, %v1652_v53 }
 0x1f4   : > { %v663_v15 = vsub.f32 0.0, %v655_v14  ;;  %v640_v20 = vpop.permute.xlu0 %639 }
 0x1f5   : > { %v657_v35 = vadd.f32 %v640_v20, %v1643_v47 }
 0x1f6   : > { %v719_v16 = vmul.f32 %v700_v63, %v663_v15 }
 0x1f7   : > { %v665_v52 = vsub.f32 0.0, %v657_v35 }
 0x1f8   : > { %v735_v17 = vmul.f32 %v719_v16, %v719_v16 }
 0x1f9   : > { %v632_v18 = vpop.permute.xlu1 %631 }
 0x1fa   : > { %v653_v19 = vadd.f32 %v632_v18, %v1645_v48  ;;  %755 = vrot.lane.b32.xlu1 %v735_v17, %s1369_s8  ;;  %v638_v29 = vpop.permute.xlu2 %637 }
 0x1fb   : > { %v656_v33 = vadd.f32 %v638_v29, %v1660_v56 }
 0x1fc   : > { %v661_v21 = vsub.f32 0.0, %v653_v19  ;;  %v706_v27 = vpop.permute.xlu0 %705 }
 0x1fd   : > { %v664_v38 = vsub.f32 0.0, %v656_v33 }
 0x1fe   : > { %v717_v22 = vmul.f32 %v696_v12, %v661_v21 }
 0x200   : > { %v733_v23 = vmul.f32 %v717_v22, %v717_v22 }
 0x201   : > { %v642_v24 = vpop.permute.xlu1 %641 }
 0x202   : > { %v658_v25 = vadd.f32 %v642_v24, %v1647_v49  ;;  %751 = vrot.lane.b32.xlu2 %v733_v23, %s1369_s8  ;;  %v704_v45 = vpop.permute.xlu2 %703 }
 0x203   : > { %v721_v57 = vmul.f32 %v704_v45, %v665_v52 }
 0x204   : > { %v666_v26 = vsub.f32 0.0, %v658_v25  ;;  %v600_v2 = vpop.permute.xlu0 %599 }
 0x205   : > { %v737_v60 = vmul.f32 %v721_v57, %v721_v57  ;;  %v621_v8 = vsub.f32 %v1645_v48, %v600_v2 }
 0x206   : > { %v722_v28 = vmul.f32 %v706_v27, %v666_v26 }
 0x207   : > { %v677_v15 = vmul.f32 %v1623_v40, %v621_v8 }
 0x208   : > { %v738_v30 = vmul.f32 %v722_v28, %v722_v28 }
 0x209   : > { %v634_v31 = vpop.permute.xlu1 %633 }
 0x20a   : > { %v654_v32 = vadd.f32 %v634_v31, %v1649_v50  ;;  %761 = vrot.lane.b32.xlu1 %v738_v30, %s1369_s8  ;;  %v598_v62 = vpop.permute.xlu2 %597 }
 0x20b   : > { %v620_v5 = vsub.f32 %v1635_v44, %v598_v62 }
 0x20c   : > { %v662_v34 = vsub.f32 0.0, %v654_v32 }
 0x20e   : > { %v718_v36 = vmul.f32 %v698_v10, %v662_v34  ;;  %v676_v10 = vmul.f32 %v1605_v37, %v620_v5  ;;  %v725_v37 = vmul.f32 %v677_v15, %v677_v15 }
 0x210   : > { %v734_v43 = vmul.f32 %v718_v36, %v718_v36  ;;  %v724_v17 = vmul.f32 %v676_v10, %v676_v10 }
 0x211   : > { %v702_v51 = vpop.permute.xlu1 %701  ;;  %v606_v6 = vpop.permute.xlu0 %605 }
 0x212   : > { %v720_v55 = vmul.f32 %v702_v51, %v664_v38  ;;  %753 = vrot.lane.b32.xlu0 %v734_v43, %s1369_s8  ;;  %v604_v0 = vpop.permute.xlu2 %603  ;;  %v624_v11 = vsub.f32 %v1660_v56, %v606_v6 }
 0x213   : > { %v623_v14 = vsub.f32 %v1652_v53, %v604_v0 }
 0x214   : > { %v736_v58 = vmul.f32 %v720_v55, %v720_v55  ;;  %v680_v16 = vmul.f32 %v1667_v59, %v624_v11 }
 0x216   : > { %757 = vrot.lane.b32.xlu2 %v736_v58, %s1369_s8  ;;  %v728_v20 = vmul.f32 %v680_v16, %v680_v16 }
 0x219   : > { %v596_v63 = vpop.permute.xlu1 %595 }
 0x21a   : > { %759 = vrot.lane.b32.xlu0 %v737_v60, %s1369_s8  ;;  %v610_v3 = vpop.permute.xlu2 %609  ;;  %v619_v7 = vsub.f32 %v1627_v41, %v596_v63  ;;  %v679_v41 = vmul.f32 %v1610_v39, %v623_v14 }
 0x21b   : > { %v626_v53 = vsub.f32 %v1647_v49, %v610_v3 }
 0x21c   : > { %v675_v12 = vmul.f32 %v1630_v42, %v619_v7  ;;  %v727_v40 = vmul.f32 %v679_v41, %v679_v41 }
 0x21d   : > { %v682_v22 = vmul.f32 %v1656_v54, %v626_v53 }
 0x21e   : > { %v723_v18 = vmul.f32 %v675_v12, %v675_v12 }
 0x21f   : > { %v730_v25 = vmul.f32 %v682_v22, %v682_v22 }
 0x221   : > { %v602_v1 = vpop.permute.xlu1 %601 }
 0x222   : > { %v622_v49 = vsub.f32 %v1649_v50, %v602_v1 }
 0x224   : > { %v678_v54 = vmul.f32 %v1638_v46, %v622_v49 }
 0x226   : > { %v726_v45 = vmul.f32 %v678_v54, %v678_v54 }
 0x229   : > { %v1700_v4 = vpop.permute.xlu1 %607 }
 0x22a   : > { %v625_v38 = vsub.f32 %v1643_v47, %v1700_v4 }
 0x22c   : > { %v681_v63 = vmul.f32 %v1674_v61, %v625_v38 }
 0x22e   : > { %v729_v6 = vmul.f32 %v681_v63, %v681_v63 }
 0x254   : > { %v748_v44 = vpop.permute.xlu0 %747 }
 0x255   : > { %v1714_v19 = vadd.f32 %v748_v44, %v723_v18 }
 0x257   : > { %vm786_vm1 = vcmp.eq.f32.partialorder %v1714_v19, inf  ;;  %vm788_vm5 = vcmp.eq.f32.partialorder %v1714_v19, 0.0 }
 0x25c   : > { %v752_v9 = vpop.permute.xlu2 %751  ;;  %v750_v13 = vpop.permute.xlu1 %749 }
 0x25d   : > { %v1712_v48 = vadd.f32 %v750_v13, %v724_v17  ;;  %v1716_v42 = vadd.f32 %v752_v9, %v725_v37  ;;  %v789_v37 = vand.u32 2147483648, %v1714_v19 }
 0x25f   : > { %1154 = vrsqrt.f32 %v1712_v48  ;;  %vm798_vm2 = vcmp.eq.f32.partialorder %v1712_v48, inf  ;;  %vm800_vm3 = vcmp.eq.f32.partialorder %v1712_v48, 0.0  ;;  %vm810_vm4 = vcmp.eq.f32.partialorder %v1716_v42, inf }
 0x260   : > { %1156 = vrsqrt.f32 %v1714_v19  ;;  %vm812_vm6 = vcmp.eq.f32.partialorder %v1716_v42, 0.0 }
 0x261   : > { %1158 = vrsqrt.f32 %v1716_v42 }
 0x265   : > { %v1155_v23 = vpop.eup %1154 }
 0x266   : > { %v1157_v24 = vpop.eup %1156  ;;  %v792_v27 = vmul.f32 %v1155_v23, %v1712_v48 }
 0x267   : > { %v1159_v26 = vpop.eup %1158  ;;  %v780_v30 = vmul.f32 %v1157_v24, %v1714_v19 }
 0x268   : > { %v804_v33 = vmul.f32 %v1159_v26, %v1716_v42  ;;  %v793_v34 = vmul.f32 %v1155_v23, %v792_v27 }
 0x269   : > { %v781_v35 = vmul.f32 %v1157_v24, %v780_v30 }
 0x26a   : > { %v805_v43 = vmul.f32 %v1159_v26, %v804_v33  ;;  %v794_v51 = vmul.f32 0.5, %v793_v34 }
 0x26b   : > { %v782_v46 = vmul.f32 0.5, %v781_v35 }
 0x26c   : > { %v756_v21 = vpop.permute.xlu1 %755  ;;  %v806_v0 = vmul.f32 0.5, %v805_v43  ;;  %v795_v1 = vsub.f32 1.5, %v794_v51 }
 0x26d   : > { %v1723_v39 = vadd.f32 %v756_v21, %v727_v40  ;;  %v783_v3 = vsub.f32 1.5, %v782_v46  ;;  %v801_v21 = vand.u32 2147483648, %v1712_v48 }
 0x26e   : > { %v807_v5 = vsub.f32 1.5, %v806_v0  ;;  %v796_v7 = vmul.f32 %v1155_v23, %v795_v1 }
 0x26f   : > { %v784_v12 = vmul.f32 %v1157_v24, %v783_v3  ;;  %vm834_vm7 = vcmp.eq.f32.partialorder %v1723_v39, inf  ;;  %vm836_vm8 = vcmp.eq.f32.partialorder %v1723_v39, 0.0  ;;  %v837_v54 = vand.u32 2147483648, %v1723_v39 }
 0x270   : > { %v758_v56 = vpop.permute.xlu2 %757  ;;  %v808_v15 = vmul.f32 %v1159_v26, %v807_v5  ;;  %v797_v16 = vmul.f32 %v796_v7, %v1712_v48  ;;  %v813_v26 = vand.u32 2147483648, %v1716_v42 }
 0x271   : > { %v1720_v59 = vadd.f32 %v758_v56, %v728_v20  ;;  %v785_v41 = vmul.f32 %v784_v12, %v1714_v19 }
 0x272   : > { %v809_v53 = vmul.f32 %v808_v15, %v1716_v42  ;;  %v799_v40 = vsel %vm798_vm2, %v1712_v48, %v797_v16  ;;  %vm898_vm2 = vcmask 122880  }
 0x273   : > { %1160 = vrsqrt.f32 %v1720_v59  ;;  %v802_v30 = vsel %vm800_vm3, %v801_v21, %v799_v40  ;;  %vm846_vm9 = vcmp.eq.f32.partialorder %v1720_v59, inf  ;;  %vm848_vm10 = vcmp.eq.f32.partialorder %v1720_v59, 0.0 }
 0x274   : > { %1162 = vrsqrt.f32 %v1723_v39  ;;  %v849_v48 = vand.u32 2147483648, %v1720_v59 }
 0x279   : > { %v1161_v29 = vpop.eup %1160 }
 0x27a   : > { %v1163_v32 = vpop.eup %1162  ;;  %v840_v50 = vmul.f32 %v1161_v29, %v1720_v59 }
 0x27b   : > { %v828_v36 = vmul.f32 %v1163_v32, %v1723_v39 }
 0x27c   : > { %v762_v28 = vpop.permute.xlu1 %761  ;;  %v841_v52 = vmul.f32 %v1161_v29, %v840_v50 }
 0x27d   : > { %v1732_v31 = vadd.f32 %v762_v28, %v730_v25  ;;  %v829_v60 = vmul.f32 %v1163_v32, %v828_v36  ;;  %v787_v25 = vsel %vm786_vm1, %v1714_v19, %v785_v41 }
 0x27e   : > { %v842_v2 = vmul.f32 0.5, %v841_v52 }
 0x27f   : > { %1164 = vrsqrt.f32 %v1732_v31  ;;  %v830_v4 = vmul.f32 0.5, %v829_v60  ;;  %vm870_vm13 = vcmp.eq.f32.partialorder %v1732_v31, inf  ;;  %vm872_vm14 = vcmp.eq.f32.partialorder %v1732_v31, 0.0 }
 0x280   : > { %v843_v8 = vsub.f32 1.5, %v842_v2 }
 0x281   : > { %v831_v14 = vsub.f32 1.5, %v830_v4 }
 0x282   : > { %v844_v44 = vmul.f32 %v1161_v29, %v843_v8 }
 0x283   : > { %v832_v56 = vmul.f32 %v1163_v32, %v831_v14  ;;  %v811_v32 = vsel %vm810_vm4, %v1716_v42, %v809_v53  ;;  %v873_v42 = vand.u32 2147483648, %v1732_v31 }
 0x284   : > { %v754_v55 = vpop.permute.xlu0 %753  ;;  %v845_v22 = vmul.f32 %v844_v44, %v1720_v59  ;;  %v814_v51 = vsel %vm812_vm6, %v813_v26, %v811_v32 }
 0x285   : > { %v1165_v57 = vpop.eup %1164  ;;  %v1741_v58 = vadd.f32 %v754_v55, %v726_v45  ;;  %v833_v27 = vmul.f32 %v832_v56, %v1723_v39  ;;  %v882_v55 = vsel %vm389_vm0, %v802_v30, 0.0  ;;  %v876_v0 = vsel %vm389_vm0, %v814_v51, 0.0 }
 0x286   : > { %v864_v62 = vmul.f32 %v1165_v57, %v1732_v31  ;;  %v847_v33 = vsel %vm846_vm9, %v1720_v59, %v845_v22 }
 0x287   : > { %1166 = vrsqrt.f32 %v1741_v58  ;;  %vm822_vm11 = vcmp.eq.f32.partialorder %v1741_v58, inf  ;;  %v825_v36 = vand.u32 2147483648, %v1741_v58  ;;  %v835_v38 = vsel %vm834_vm7, %v1723_v39, %v833_v27 }
 0x288   : > { %v865_v47 = vmul.f32 %v1165_v57, %v864_v62  ;;  %vm824_vm12 = vcmp.eq.f32.partialorder %v1741_v58, 0.0  ;;  %v850_v52 = vsel %vm848_vm10, %v849_v48, %v847_v33  ;;  %v790_v62 = vsel %vm788_vm5, %v789_v37, %v787_v25 }
 0x289   : > { %v885_v1 = vsel %vm389_vm0, %v850_v52, 0.0  ;;  %v875_v4 = vsel %vm389_vm0, %v790_v62, 0.0 }
 0x28a   : > { %v866_v9 = vmul.f32 0.5, %v865_v47  ;;  %v877_v39 = vadd.f32 %v876_v0, %v875_v4 }
 0x28c   : > { %v760_v10 = vpop.permute.xlu0 %759  ;;  %v867_v17 = vsub.f32 1.5, %v866_v9 }
 0x28d   : > { %v1167_v11 = vpop.eup %1166  ;;  %v1746_v13 = vadd.f32 %v760_v10, %v729_v6 }
 0x28e   : > { %v816_v61 = vmul.f32 %v1167_v11, %v1741_v58  ;;  %v868_v23 = vmul.f32 %v1165_v57, %v867_v17 }
 0x28f   : > { %1168 = vrsqrt.f32 %v1746_v13  ;;  %vm858_vm15 = vcmp.eq.f32.partialorder %v1746_v13, inf  ;;  %v861_v6 = vand.u32 2147483648, %v1746_v13  ;;  %vm860_vm1 = vcmp.eq.f32.partialorder %v1746_v13, 0.0 }
 0x290   : > { %v817_v18 = vmul.f32 %v1167_v11, %v816_v61  ;;  %v869_v34 = vmul.f32 %v868_v23, %v1732_v31 }
 0x292   : > { %v818_v20 = vmul.f32 0.5, %v817_v18  ;;  %v871_v57 = vsel %vm870_vm13, %v1732_v31, %v869_v34 }
 0x293   : > { %v874_v47 = vsel %vm872_vm14, %v873_v42, %v871_v57 }
 0x294   : > { %v819_v24 = vsub.f32 1.5, %v818_v20  ;;  %v887_v7 = vsel %vm389_vm0, %v874_v47, 0.0 }
 0x295   : > { %v1169_v49 = vpop.eup %1168 }
 0x296   : > { %v820_v28 = vmul.f32 %v1167_v11, %v819_v24  ;;  %v852_v29 = vmul.f32 %v1169_v49, %v1746_v13 }
 0x298   : > { %v821_v50 = vmul.f32 %v820_v28, %v1741_v58  ;;  %v853_v35 = vmul.f32 %v1169_v49, %v852_v29 }
 0x29a   : > { %v823_v43 = vsel %vm822_vm11, %v1741_v58, %v821_v50  ;;  %v854_v45 = vmul.f32 0.5, %v853_v35  ;;  %v838_v58 = vsel %vm836_vm8, %v837_v54, %v835_v38 }
 0x29b   : > { %v826_v59 = vsel %vm824_vm12, %v825_v36, %v823_v43  ;;  %v878_v19 = vsel %vm389_vm0, %v838_v58, 0.0 }
 0x29c   : > { %v883_v46 = vsel %vm389_vm0, %v826_v59, 0.0  ;;  %v855_v60 = vsub.f32 1.5, %v854_v45  ;;  %v879_v8 = vadd.f32 %v878_v19, %v877_v39 }
 0x29d   : > { %v884_v63 = vadd.f32 %v883_v46, %v882_v55 }
 0x29e   : > { %v856_v2 = vmul.f32 %v1169_v49, %v855_v60 }
 0x29f   : > { %v886_v3 = vadd.f32 %v885_v1, %v884_v63 }
 0x2a0   : > { %v857_v5 = vmul.f32 %v856_v2, %v1746_v13 }
 0x2a1   : > { %v888_v9 = vadd.f32 %v887_v7, %v886_v3 }
 0x2a2   : > { %v859_v31 = vsel %vm858_vm15, %v1746_v13, %v857_v5 }
 0x2a3   : > { %v862_v10 = vsel %vm860_vm1, %v861_v6, %v859_v31  ;;  %v890_v61 = vsel %vm389_vm0, %v888_v9, 0.0 }
 0x2a4   : > { %v880_v11 = vsel %vm389_vm0, %v862_v10, 0.0 }
 0x2a5   : > { %v881_v12 = vadd.f32 %v880_v11, %v879_v8 }
 0x2a7   : > { %v889_v14 = vsel %vm389_vm0, %v881_v12, 0.0 }
 0x2a8   : > { %v891_v15 = vadd.f32 %v890_v61, %v889_v14 }
 0x2aa   : > { %v892_v16 = vrot.slane %v891_v15, 4 }
 0x2ac   : > { %v893_v44 = vadd.f32 %v892_v16, %v891_v15 }
 0x2ae   : > { %v894_v17 = vrot.slane %v893_v44, 2 }
 0x2b0   : > { %v895_v18 = vadd.f32 %v894_v17, %v893_v44 }
 0x2b2   : > { %v896_v41 = vrot.slane %v895_v18, 1 }
 0x2b4   : > { %v897_v13 = vadd.f32 %v896_v41, %v895_v18 }
 0x2b6   : > { %899 = vst.msk [vmem:[%s362_s17] sm:$0x1] %vm898_vm2, %v897_v13 }
 0x2b7 PF: > { %p19_p4 = scmp.ge.s32.totalorder %s1447_s6, 4   ;;  %s1845_s18 = smov %s1354_s19 }
 0x2b8   : > { %s1846_s19 = smov %s1358_s20  ;;  %s1847_s20 = smov %s1462_s11 }
 0x2b9   : > { %s1848_s21 = smov %s1447_s6  ;;  %21 = sbr.rel (!%p19_p4) target bundleno = 8 (0x8), region = 112 }
 0x2be   :  { %917 = vsyncpa [#allocation3], 1 }
 0x2bf   :  { %919 = vsyncpa [#allocation3 + $0x1], 1 }
 0x2c0   :  { %920 = vsyncpa [#allocation5], 1 }
 0x2c1   :  { %922 = vsyncpa [#allocation5 + $0x1], 1 }
 0x2c2   :  { %923 = vsyncpa [#allocation8], 1 }

</bundles_post_ra>
